<compile_context>
chip_gen: v6e
topology: v6e:2x2x1
jax: 0.10.0
libtpu: 0.0.40
codegen_flags: <defaults>
</compile_context>

<pallas_src>
import functools

import jax
import jax.numpy as jnp
from jax.experimental import pallas as pl
from jax.experimental.pallas import tpu as pltpu

_MASK_VAL = -9000000000000000.0  # same sentinel as the PyTorch reference (f32-safe)


def _round_up(x, m):
    return (x + m - 1) // m * m


def _choose_tiles(n):
    """Return (n_pad, tq, tk): n_pad multiple of 128, tq | n_pad, tk | n_pad."""
    n_pad = _round_up(n, 128)
    tk = max(t for t in (128, 256, 512) if n_pad % t == 0)
    # Keep the parallel qi axis >= 2 tiles when possible (v7x has 2 TensorCores).
    tq_cap = max(128, n_pad // 2)
    tq = max(t for t in (128, 256, 512, 1024) if n_pad % t == 0 and t <= tq_cap)
    return n_pad, tq, tk


# ----------------------------------------------------------------------------
# Prologue: Wh = h @ W (once, bf16 MXU inputs / f32 acc), f1 = Wh@a1, f2 = Wh@a2
# as VPU broadcast-multiply + lane reductions, plus the fused ones column.
# ----------------------------------------------------------------------------
def _gat_project_kernel(h_ref, w_ref, a1_ref, a2_ref, wh_ref, f1_ref, f2_ref,
                        *, ones_col):
    wh = jnp.dot(h_ref[...], w_ref[...], preferred_element_type=jnp.float32)
    # a1/a2 are zero beyond out_dim, so padding / ones column never leak in.
    f1_ref[...] = jnp.sum(wh * a1_ref[...], axis=1, keepdims=True)
    f2_ref[...] = jnp.sum(wh * a2_ref[...], axis=1, keepdims=True)
    # Ones column fuses the softmax denominator into the p @ Wh MXU matmul.
    col = jax.lax.broadcasted_iota(jnp.int32, wh.shape, 1)
    wh_ref[...] = jnp.where(col == ones_col, 1.0, wh).astype(wh_ref.dtype)


# ----------------------------------------------------------------------------
# Main: tiled online-softmax graph attention with block-sparsity skipping.
# ----------------------------------------------------------------------------
def _gat_attention_kernel(cnt_ref, blk_ref, f1_ref, f2_ref, adj_ref, wh_ref,
                          o_ref, m_sc, acc_sc, *, alpha, concat, ones_col):
    qi = pl.program_id(0)
    t = pl.program_id(1)

    @pl.when(t == 0)
    def _init():
        m_sc[...] = jnp.full_like(m_sc, _MASK_VAL)
        acc_sc[...] = jnp.zeros_like(acc_sc)

    # Only the first cnt_ref[qi] steps point at neighbor tiles that actually
    # contain edges; later steps alias the last non-empty tile (no new DMA)
    # and are skipped entirely here.
    @pl.when(t < cnt_ref[qi])
    def _update():
        # e[i, j] = leakyrelu(f1[i] + f2[j]); LeakyReLU + adjacency mask fused.
        e = f1_ref[...] + f2_ref[...]                          # (tq, tk) f32
        if 0.0 < alpha < 1.0:
            e = jnp.maximum(e, alpha * e)                      # 1 VPU op LeakyReLU
        else:
            e = jnp.where(e > 0, e, alpha * e)
        e = jnp.where(adj_ref[...] > 0, e, _MASK_VAL)

        # Online softmax (f32 accumulation, bf16 MXU inputs).  The row-sum of
        # p rides along in acc's ones column -> no separate l update.
        m_prev = m_sc[...]
        m_new = jnp.maximum(m_prev, jnp.max(e, axis=1, keepdims=True))
        corr = jnp.exp(m_prev - m_new)
        p = jnp.exp(e - m_new)
        acc_sc[...] = corr * acc_sc[...] + jnp.dot(
            p.astype(wh_ref.dtype), wh_ref[...],
            preferred_element_type=jnp.float32)
        m_sc[...] = m_new

    @pl.when(t == pl.num_programs(1) - 1)
    def _finalize():
        acc = acc_sc[...]
        # Extract the fused denominator column (masked reduce is layout-safe).
        col = jax.lax.broadcasted_iota(jnp.int32, acc.shape, 1)
        l = jnp.sum(jnp.where(col == ones_col, acc, 0.0), axis=1, keepdims=True)
        l = jnp.where(l > 0.0, l, 1.0)   # fully-masked / padded rows -> output 0
        h_prime = acc * pl.reciprocal(l, approx=True)
        if concat:
            # ELU(alpha=1): x if x > 0 else exp(x) - 1
            h_prime = jnp.where(h_prime > 0, h_prime,
                                jnp.expm1(jnp.minimum(h_prime, 0.0)))
        o_ref[...] = h_prime.astype(o_ref.dtype)


def gat_forward(h, A, W, a, *, alpha=0.2, concat=True):
    N, in_dim = h.shape
    out_dim = W.shape[1]
    n_pad, tq, tk = _choose_tiles(N)
    in_pad = _round_up(in_dim, 128)
    d_pad = _round_up(out_dim + 1, 128)          # +1: fused ones column for sum(p)
    ones_col = out_dim
    f32, bf16 = jnp.float32, jnp.bfloat16

    # ---- pad / repack inputs (padded nodes have A == 0, i.e. fully masked) ----
    h_p = jnp.zeros((n_pad, in_pad), bf16).at[:N, :in_dim].set(h.astype(bf16))
    W_p = jnp.zeros((in_pad, d_pad), bf16).at[:in_dim, :out_dim].set(W.astype(bf16))
    a1_row = jnp.zeros((1, d_pad), f32).at[0, :out_dim].set(a[:out_dim, 0].astype(f32))
    a2_row = jnp.zeros((1, d_pad), f32).at[0, :out_dim].set(a[out_dim:, 0].astype(f32))
    # Adjacency as int8: only the sign matters; 4x less HBM traffic / VMEM.
    adj = jnp.zeros((n_pad, n_pad), jnp.int8).at[:N, :N].set((A > 0).astype(jnp.int8))

    # ---- prologue: Wh (+ ones column), f1, f2 computed exactly once -----------
    wh, f1, f2_col = pl.pallas_call(
        functools.partial(_gat_project_kernel, ones_col=ones_col),
        out_shape=(
            jax.ShapeDtypeStruct((n_pad, d_pad), bf16),
            jax.ShapeDtypeStruct((n_pad, 1), f32),
            jax.ShapeDtypeStruct((n_pad, 1), f32),
        ),
        grid=(n_pad // tq,),
        in_specs=[
            pl.BlockSpec((tq, in_pad), lambda i: (i, 0)),
            pl.BlockSpec((in_pad, d_pad), lambda i: (0, 0)),
            pl.BlockSpec((1, d_pad), lambda i: (0, 0)),
            pl.BlockSpec((1, d_pad), lambda i: (0, 0)),
        ],
        out_specs=(
            pl.BlockSpec((tq, d_pad), lambda i: (i, 0)),
            pl.BlockSpec((tq, 1), lambda i: (i, 0)),
            pl.BlockSpec((tq, 1), lambda i: (i, 0)),
        ),
        compiler_params=pltpu.CompilerParams(
            dimension_semantics=("parallel",),
            vmem_limit_bytes=48 * 1024 * 1024),
    )(h_p, W_p, a1_row, a2_row)

    # One-time relayout to a (1, N) row so the kernel never transposes per tile.
    f2_row = f2_col.reshape(1, n_pad)

    # ---- block-sparsity metadata (scalar-prefetched into SMEM) ----------------
    nq, nk = n_pad // tq, n_pad // tk
    tile_nz = jnp.any((adj > 0).reshape(nq, tq, nk, tk), axis=(1, 3))    # (nq, nk)
    counts = jnp.sum(tile_nz, axis=1).astype(jnp.int32)                  # (nq,)
    order = jnp.argsort((~tile_nz).astype(jnp.int32), axis=1).astype(jnp.int32)
    last_valid = jnp.take_along_axis(order, jnp.maximum(counts - 1, 0)[:, None], axis=1)
    t_idx = jnp.arange(nk, dtype=jnp.int32)[None, :]
    # Padding steps alias the last non-empty block -> Pallas skips the re-DMA.
    blk_ids = jnp.where(t_idx < counts[:, None], order, last_valid).astype(jnp.int32)

    # ---- main: flash-style tiled online-softmax attention ---------------------
    kernel = functools.partial(_gat_attention_kernel, alpha=alpha, concat=concat,
                               ones_col=ones_col)
    out = pl.pallas_call(
        kernel,
        out_shape=jax.ShapeDtypeStruct((n_pad, d_pad), h.dtype),
        grid_spec=pltpu.PrefetchScalarGridSpec(
            num_scalar_prefetch=2,
            grid=(nq, nk),
            in_specs=[
                pl.BlockSpec((tq, 1), lambda qi, t, cnt, blk: (qi, 0)),            # f1
                pl.BlockSpec((1, tk), lambda qi, t, cnt, blk: (0, blk[qi, t])),    # f2 row
                pl.BlockSpec((tq, tk), lambda qi, t, cnt, blk: (qi, blk[qi, t])),  # adj (int8)
                pl.BlockSpec((tk, d_pad), lambda qi, t, cnt, blk: (blk[qi, t], 0)),# Wh (bf16)
            ],
            out_specs=pl.BlockSpec((tq, d_pad), lambda qi, t, cnt, blk: (qi, 0)),
            scratch_shapes=[
                pltpu.VMEM((tq, 1), f32),      # running max m
                pltpu.VMEM((tq, d_pad), f32),  # running numerator (+ fused sum(p) col)
            ],
        ),
        compiler_params=pltpu.CompilerParams(
            dimension_semantics=("parallel", "arbitrary"),
            vmem_limit_bytes=48 * 1024 * 1024),
    )(counts, blk_ids, f1, f2_row, adj, wh)

    return out[:N, :out_dim]


def gat_reference(h, A, W, a, *, alpha=0.2, concat=True):
    """Pure-JAX f32 reference mirroring the PyTorch forward (eval mode)."""
    N = h.shape[0]
    out_dim = W.shape[1]
    Wh = h @ W
    rep = jnp.repeat(Wh, N, axis=0)                  # repeat_interleave(N, dim=0)
    alt = jnp.tile(Wh, (N, 1))                       # repeat(N, 1)
    attn_input = jnp.concatenate([rep, alt], axis=1).reshape(N, N, 2 * out_dim)
    e = (attn_input @ a)[..., 0]
    e = jnp.where(e > 0, e, alpha * e)
    e = jnp.where(A > 0, e, jnp.full_like(e, _MASK_VAL))
    attention = jax.nn.softmax(e, axis=1)
    h_prime = attention @ Wh
    return jax.nn.elu(h_prime) if concat else h_prime


def xavier_uniform(key, shape, gain):
    fan_in, fan_out = shape[0], shape[1]
    bound = gain * jnp.sqrt(6.0 / (fan_in + fan_out))
    return jax.random.uniform(key, shape, jnp.float32, -bound, bound)


if __name__ == "__main__":
    N, in_dim, out_dim = 8, 16, 32
    dropout, alpha, concat = 0.1, 0.2, True

    key = jax.random.PRNGKey(0)
    k_h, k_A, k_W, k_a = jax.random.split(key, 4)

    h = jax.random.normal(k_h, (N, in_dim), jnp.float32)
    # Deterministic adjacency with self-loops (no fully-isolated rows).
    A = (jax.random.uniform(k_A, (N, N)) > 0.5).astype(jnp.float32)
    A = jnp.maximum(A, jnp.eye(N, dtype=jnp.float32))

    W = xavier_uniform(k_W, (in_dim, out_dim), gain=1.414)
    a = xavier_uniform(k_a, (2 * out_dim, 1), gain=1.414)

    out = gat_forward(h, A, W, a, alpha=alpha, concat=concat)
    out = jax.block_until_ready(out)

    ref = gat_reference(h, A, W, a, alpha=alpha, concat=concat)
    assert out.shape == (N, out_dim)
    # bf16 projection + bf16 value path (p / Wh) + approx reciprocal -> bf16-level tolerance.
    assert jnp.allclose(out, ref, atol=5e-2, rtol=5e-2), "mismatch vs reference"

    print("KERNEL_OK")
</pallas_src>

<mosaic_0001>
module attributes {stable_mosaic.version = 11 : i64} {
  func.func @_gat_project_kernel(%arg0: i32, %arg1: memref<128x128xbf16, #tpu.memory_space<vmem>>, %arg2: memref<128x128xbf16, #tpu.memory_space<vmem>>, %arg3: memref<1x128xf32, #tpu.memory_space<vmem>>, %arg4: memref<1x128xf32, #tpu.memory_space<vmem>>, %arg5: memref<128x128xbf16, #tpu.memory_space<vmem>>, %arg6: memref<128x1xf32, #tpu.memory_space<vmem>>, %arg7: memref<128x1xf32, #tpu.memory_space<vmem>>) attributes {dimension_semantics = [#tpu.dimension_semantics<parallel>], iteration_bounds = array<i64: 1>, scalar_prefetch = 0 : i64, scratch_operands = 0 : i64, tpu.core_type = #tpu.core_type<tc>, window_params = [{transform_indices = @transform_0, window_bounds = array<i64: 128, 128>}, {pipeline_mode = #tpu.pipeline_mode<synchronous>, transform_indices = @transform_1, window_bounds = array<i64: 128, 128>}, {pipeline_mode = #tpu.pipeline_mode<synchronous>, transform_indices = @transform_2, window_bounds = array<i64: 1, 128>}, {pipeline_mode = #tpu.pipeline_mode<synchronous>, transform_indices = @transform_3, window_bounds = array<i64: 1, 128>}, {transform_indices = @transform_4, window_bounds = array<i64: 128, 128>}, {transform_indices = @transform_5, window_bounds = array<i64: 128, 1>}, {transform_indices = @transform_6, window_bounds = array<i64: 128, 1>}]} {
    %c0 = arith.constant 0 : index
    %c0_0 = arith.constant 0 : index
    %0 = vector.load %arg1[%c0, %c0_0] : memref<128x128xbf16, #tpu.memory_space<vmem>>, vector<128x128xbf16>
    %c0_1 = arith.constant 0 : index
    %c0_2 = arith.constant 0 : index
    %1 = vector.load %arg2[%c0_1, %c0_2] : memref<128x128xbf16, #tpu.memory_space<vmem>>, vector<128x128xbf16>
    %cst = arith.constant dense<0.000000e+00> : vector<128x128xf32>
    %2 = tpu.matmul %0, %1, %cst {dimension_numbers = #tpu.dot_dimension_numbers<[1], [0], [0], [1], [0, 0, 1, 1], [], []>} : vector<128x128xbf16>, vector<128x128xbf16>, vector<128x128xf32> -> vector<128x128xf32>
    %c0_3 = arith.constant 0 : index
    %c0_4 = arith.constant 0 : index
    %3 = vector.load %arg3[%c0_3, %c0_4] : memref<1x128xf32, #tpu.memory_space<vmem>>, vector<1x128xf32>
    %4 = vector.broadcast %3 : vector<1x128xf32> to vector<128x128xf32>
    %5 = arith.mulf %2, %4 : vector<128x128xf32>
    %cst_5 = arith.constant dense<0.000000e+00> : vector<128xf32>
    %6 = vector.multi_reduction <add>, %5, %cst_5 [1] : vector<128x128xf32> to vector<128xf32>
    %7 = vector.shape_cast %6 : vector<128xf32> to vector<128x1xf32>
    %c0_6 = arith.constant 0 : index
    %c0_7 = arith.constant 0 : index
    %8 = vector.load %arg6[%c0_6, %c0_7] : memref<128x1xf32, #tpu.memory_space<vmem>>, vector<128x1xf32>
    tpu.vector_store %arg6[%c0_6, %c0_7], %7 {strides = array<i32>} : memref<128x1xf32, #tpu.memory_space<vmem>>, vector<128x1xf32>,
    %c0_8 = arith.constant 0 : index
    %c0_9 = arith.constant 0 : index
    %9 = vector.load %arg4[%c0_8, %c0_9] : memref<1x128xf32, #tpu.memory_space<vmem>>, vector<1x128xf32>
    %10 = vector.broadcast %9 : vector<1x128xf32> to vector<128x128xf32>
    %11 = arith.mulf %2, %10 : vector<128x128xf32>
    %cst_10 = arith.constant dense<0.000000e+00> : vector<128xf32>
    %12 = vector.multi_reduction <add>, %11, %cst_10 [1] : vector<128x128xf32> to vector<128xf32>
    %13 = vector.shape_cast %12 : vector<128xf32> to vector<128x1xf32>
    %c0_11 = arith.constant 0 : index
    %c0_12 = arith.constant 0 : index
    %14 = vector.load %arg7[%c0_11, %c0_12] : memref<128x1xf32, #tpu.memory_space<vmem>>, vector<128x1xf32>
    tpu.vector_store %arg7[%c0_11, %c0_12], %13 {strides = array<i32>} : memref<128x1xf32, #tpu.memory_space<vmem>>, vector<128x1xf32>,
    %15 = tpu.iota {dimensions = array<i32: 1>} : vector<128x128xi32>
    %c32_i32 = arith.constant 32 : i32
    %16 = vector.broadcast %c32_i32 : i32 to vector<128x128xi32>
    %17 = arith.cmpi eq, %15, %16 : vector<128x128xi32>
    %cst_13 = arith.constant 1.000000e+00 : f32
    %18 = vector.broadcast %cst_13 : f32 to vector<128x128xf32>
    %19 = arith.select %17, %18, %2 : vector<128x128xi1>, vector<128x128xf32>
    %20 = arith.truncf %19 : vector<128x128xf32> to vector<128x128xbf16>
    %c0_14 = arith.constant 0 : index
    %c0_15 = arith.constant 0 : index
    %21 = vector.load %arg5[%c0_14, %c0_15] : memref<128x128xbf16, #tpu.memory_space<vmem>>, vector<128x128xbf16>
    tpu.vector_store %arg5[%c0_14, %c0_15], %20 {strides = array<i32>} : memref<128x128xbf16, #tpu.memory_space<vmem>>, vector<128x128xbf16>,
    return
  }
  func.func @transform_0(%arg0: i32) -> (i32, i32) {
    %c0_i32 = arith.constant 0 : i32
    %c0_i32_0 = arith.constant 0 : i32
    return %arg0, %c0_i32 : i32, i32
  }
  func.func @transform_1(%arg0: i32) -> (i32, i32) {
    %c0_i32 = arith.constant 0 : i32
    %c0_i32_0 = arith.constant 0 : i32
    %c0_i32_1 = arith.constant 0 : i32
    return %c0_i32, %c0_i32_0 : i32, i32
  }
  func.func @transform_2(%arg0: i32) -> (i32, i32) {
    %c0_i32 = arith.constant 0 : i32
    %c0_i32_0 = arith.constant 0 : i32
    %c0_i32_1 = arith.constant 0 : i32
    return %c0_i32, %c0_i32_0 : i32, i32
  }
  func.func @transform_3(%arg0: i32) -> (i32, i32) {
    %c0_i32 = arith.constant 0 : i32
    %c0_i32_0 = arith.constant 0 : i32
    %c0_i32_1 = arith.constant 0 : i32
    return %c0_i32, %c0_i32_0 : i32, i32
  }
  func.func @transform_4(%arg0: i32) -> (i32, i32) {
    %c0_i32 = arith.constant 0 : i32
    %c0_i32_0 = arith.constant 0 : i32
    return %arg0, %c0_i32 : i32, i32
  }
  func.func @transform_5(%arg0: i32) -> (i32, i32) {
    %c0_i32 = arith.constant 0 : i32
    %c0_i32_0 = arith.constant 0 : i32
    return %arg0, %c0_i32 : i32, i32
  }
  func.func @transform_6(%arg0: i32) -> (i32, i32) {
    %c0_i32 = arith.constant 0 : i32
    %c0_i32_0 = arith.constant 0 : i32
    return %arg0, %c0_i32 : i32, i32
  }
}

</mosaic_0001>

<bundles_post_ra>
// kernel: tpu_custom_call.1
= control target key start
LH: loop header
LB: loop body
LE: loop exit
PB: predicated region body
PF: predicated region fallthrough
CT: control target
= control target key end

     0   :  { %12 = vsyncpa [#allocation3], 0  ;;  %s1065_s0 = inlined_call_operand.hbm [shape: bf16[128,128], index: 0, kind: input, shape index: {}]   ;;  %s1066_s1 = inlined_call_operand.hbm [shape: bf16[128,128], index: 1, kind: input, shape index: {}]   ;;  %s1067_s2 = inlined_call_operand.vmem [shape: f32[1,128], index: 2, kind: input, shape index: {}]   ;;  %s1068_s3 = inlined_call_operand.vmem [shape: f32[1,128], index: 3, kind: input, shape index: {}]   ;;  %s1069_s4 = inlined_call_operand.hbm [shape: bf16[128,128], index: 4, kind: output, shape index: {0}]   ;;  %s1070_s5 = inlined_call_operand.vmem [shape: f32[128,1], index: 5, kind: output, shape index: {1}]   ;;  %s1071_s6 = inlined_call_operand.vmem [shape: f32[128,1], index: 6, kind: output, shape index: {2}]  }
   0x1   :  { %13 = vsyncpa [#allocation6], 0 }
   0x2   :  { %14 = vsyncpa [#allocation4], 0  ;;  %s791_s21 = smov [#allocation2]  }
   0x3   :  { %s20_s22 = sshll.u32 %s791_s21, 4  ;;  %s21_s22 = int_to_ptr.vmem [resolvable:$true] %s20_s22 }
   0x4   :  { %s733_s23 = scalar_lea.vmem %s21_s22, 1024  ;;  %p738_p1 = scmp.lt.s32.totalorder %s21_s22, %s21_s22 }
   0x5   :  { %p734_p0 = scmp.ne.s32.totalorder %s21_s22, %s733_s23  ;;  %p739_p2 = scmp.lt.s32.totalorder %s733_s23, %s733_s23 }
   0x7   :  { %p740_p3 = por %p739_p2, %p738_p1 }
   0x9   :  { %p741_p4 = pnand %p740_p3, %p734_p0 }
   0xb   :  { %744 = shalt.err (!%p741_p4)
}
   0xc   :  { %s792_s24 = smov 64   ;;  %s793_s25 = smov 4  }
   0xd   :  { %26 = dma.hbm_to_vmem [thread:$0]  %s1065_s0, 1024, %s21_s22, [#allocation3], %s792_s24, %s792_s24, %s793_s25  }
   0xe   :  { %s794_s28 = smov [#allocation5]  }
   0xf   :  { %s32_s29 = sshll.u32 %s794_s28, 4  ;;  %s33_s29 = int_to_ptr.vmem [resolvable:$true] %s32_s29 }
  0x10   :  { %s753_s30 = scalar_lea.vmem %s33_s29, 1024  ;;  %p758_p6 = scmp.lt.s32.totalorder %s33_s29, %s33_s29 }
  0x11   :  { %p754_p5 = scmp.ne.s32.totalorder %s33_s29, %s753_s30  ;;  %p759_p7 = scmp.lt.s32.totalorder %s753_s30, %s753_s30 }
  0x13   :  { %p760_p8 = por %p759_p7, %p758_p6 }
  0x15   :  { %p761_p9 = pnand %p760_p8, %p754_p5 }
  0x17   :  { %764 = shalt.err (!%p761_p9)
}
  0x18   :  { %38 = dma.hbm_to_vmem [thread:$0]  %s1066_s1, 1024, %s33_s29, [#allocation6], %s792_s24, %s792_s24, %s793_s25  }
  0x19   :  { %785 = dma.done.wait [#allocation3], 1024  }
  0x1a   :  { %786 = vsyncadd [#allocation3], 4294966272 }
  0x1b   :  { %787 = dma.done.wait [#allocation6], 1024  }
  0x1c   :  { %788 = vsyncadd [#allocation6], 4294966272  ;;  %v709_v0 = vld [vmem:[#allocation5 + $0x38] sm:$0xff]   ;;  %v710_v1 = vld [vmem:[#allocation5 + $0x30] sm:$0xff]   ;;  %v418_v16 = vlaneseq }
  0x1d   :  { %656 = vmatprep.subr.bf16.mxu0 %v709_v0  ;;  %688 = vmatprep.subr.bf16.mxu1 %v709_v0  ;;  %v711_v2 = vld [vmem:[#allocation5 + $0x28] sm:$0xff]   ;;  %v712_v3 = vld [vmem:[#allocation5 + $0x20] sm:$0xff]   ;;  %v713_v6 = vld [vmem:[#allocation5 + $0x18] sm:$0xff]  }
  0x1e   :  { %657 = vmatpush3.bf16.msra.mxu0 %v709_v0  ;;  %696 = vmatpush3.bf16.msra.mxu1 %v709_v0  ;;  %v717_v4 = vld [vmem:[#allocation2] sm:$0xff]   ;;  %v714_v7 = vld [vmem:[#allocation5 + $0x10] sm:$0xff]   ;;  %v715_v8 = vld [vmem:[#allocation5 + $0x8] sm:$0xff]   ;;  %v419_v17 = vand.u32 127, %v418_v16 }
  0x1f   :  { %658 = vmatprep.subr.bf16.mxu0 %v710_v1  ;;  %689 = vmatprep.subr.bf16.mxu1 %v710_v1  ;;  %v718_v5 = vld [vmem:[#allocation2 + $0x20] sm:$0xff]   ;;  %v719_v10 = vld [vmem:[#allocation2 + $0x8] sm:$0xff]   ;;  %v721_v12 = vld [vmem:[#allocation2 + $0x10] sm:$0xff]  }
  0x20   :  { %672 = vmatprep.mubr.bf16.mxu0 %v717_v4  ;;  %680 = vmatprep.mubr.bf16.mxu1 %v718_v5  ;;  %v716_v9 = vld [vmem:[#allocation5] sm:$0xff]   ;;  %v720_v11 = vld [vmem:[#allocation2 + $0x28] sm:$0xff]   ;;  %v723_v13 = vld [vmem:[#allocation2 + $0x30] sm:$0xff]   ;;  %vm420_vm0 = vcmp.eq.s32.totalorder %v419_v17, 32 }
  0x21   :  { %v722_v14 = vld [vmem:[#allocation2 + $0x18] sm:$0xff]   ;;  %v846_v18 = vld [vmem:[%s1067_s2] ss:$0 sm:$0xff]  ;;  %s795_s2 = smov [#allocation7]  }
  0x22   :  { %659 = vmatpush3.bf16.msra.mxu0 %v710_v1  ;;  %697 = vmatpush3.bf16.msra.mxu1 %v710_v1  ;;  %v724_v15 = vld [vmem:[#allocation2 + $0x38] sm:$0xff]   ;;  %v857_v25 = vld [vmem:[%s1068_s3] ss:$0 sm:$0xff]  ;;  %s522_s3 = sshll.u32 %s795_s2, 4  ;;  %s523_s3 = int_to_ptr.vmem [resolvable:$true] %s522_s3 }
  0x23   :  { %660 = vmatprep.subr.bf16.mxu0 %v711_v2  ;;  %690 = vmatprep.subr.bf16.mxu1 %v711_v2  ;;  %s765_s11 = scalar_lea.vmem %s523_s3, 1024  ;;  %p770_p11 = scmp.lt.s32.totalorder %s523_s3, %s523_s3 }
  0x24   :  { %p766_p10 = scmp.ne.s32.totalorder %s523_s3, %s765_s11  ;;  %p771_p12 = scmp.lt.s32.totalorder %s765_s11, %s765_s11 }
  0x26   :  { %661 = vmatpush3.bf16.msra.mxu0 %v711_v2  ;;  %698 = vmatpush3.bf16.msra.mxu1 %v711_v2  ;;  %p772_p13 = por %p771_p12, %p770_p11 }
  0x27   :  { %662 = vmatprep.subr.bf16.mxu0 %v712_v3  ;;  %691 = vmatprep.subr.bf16.mxu1 %v712_v3 }
  0x28   :  { %p773_p0 = pnand %p772_p13, %p766_p10 }
  0x2a   :  { %663 = vmatpush3.bf16.msra.mxu0 %v712_v3  ;;  %699 = vmatpush3.bf16.msra.mxu1 %v712_v3 }
  0x2b   :  { %664 = vmatprep.subr.bf16.mxu0 %v713_v6  ;;  %692 = vmatprep.subr.bf16.mxu1 %v713_v6 }
  0x2e   :  { %665 = vmatpush3.bf16.msra.mxu0 %v713_v6  ;;  %700 = vmatpush3.bf16.msra.mxu1 %v713_v6 }
  0x2f   :  { %666 = vmatprep.subr.bf16.mxu0 %v714_v7  ;;  %693 = vmatprep.subr.bf16.mxu1 %v714_v7 }
  0x32   :  { %667 = vmatpush3.bf16.msra.mxu0 %v714_v7  ;;  %701 = vmatpush3.bf16.msra.mxu1 %v714_v7 }
  0x33   :  { %668 = vmatprep.subr.bf16.mxu0 %v715_v8  ;;  %694 = vmatprep.subr.bf16.mxu1 %v715_v8 }
  0x36   :  { %669 = vmatpush3.bf16.msra.mxu0 %v715_v8  ;;  %702 = vmatpush3.bf16.msra.mxu1 %v715_v8 }
  0x37   :  { %670 = vmatprep.subr.bf16.mxu0 %v716_v9  ;;  %695 = vmatprep.subr.bf16.mxu1 %v716_v9 }
  0x3a   :  { %671 = vmatpush3.bf16.msra.mxu0 %v716_v9  ;;  %703 = vmatpush3.bf16.msra.mxu1 %v716_v9 }
  0x3d   :  { %673 = vmatmul.mubr.bf16.vlgmr.msra.gmra.mxu0 %v719_v10  ;;  %681 = vmatmul.mubr.bf16.vlgmr.msra.gmra.mxu1 %v720_v11 }
  0x3e   :  { %676 = vmatprep.mubr.bf16.mxu0 %v721_v12  ;;  %684 = vmatprep.mubr.bf16.mxu1 %v723_v13 }
  0x45   :  { %677 = vmatmul.mubr.bf16.gmra.mxu0 %v722_v14  ;;  %685 = vmatmul.mubr.bf16.gmra.mxu1 %v724_v15 }
  0xfd   :  { %v674_v19 = vpop.f32.mrf.mxu0  ;;  %v682_v20 = vpop.f32.mrf.mxu1 }
  0xfe   :  { %v292_v21 = vmul.f32 %v682_v20, %v846_v18  ;;  %v284_v22 = vmul.f32 %v674_v19, %v846_v18  ;;  %v423_v26 = vsel %vm420_vm0, 1.0, %v674_v19  ;;  %v431_v27 = vsel %vm420_vm0, 1.0, %v682_v20 }
  0xff   :  { %v850_v23 = vpop.f32.mrf.mxu0  ;;  %v852_v24 = vpop.f32.mrf.mxu1  ;;  %v356_v32 = vmul.f32 %v674_v19, %v857_v25  ;;  %v364_v46 = vmul.f32 %v682_v20, %v857_v25 }
 0x100   :  { %318 = vadd.xlane.f32.xlu0 %v292_v21  ;;  %302 = vadd.xlane.f32.xlu1 %v284_v22  ;;  %v421_v38 = vsel %vm420_vm0, 1.0, %v850_v23  ;;  %v429_v39 = vsel %vm420_vm0, 1.0, %v852_v24  ;;  %v282_v52 = vmul.f32 %v846_v18, %v850_v23  ;;  %v290_v4 = vmul.f32 %v846_v18, %v852_v24 }
 0x101   :  { %v675_v28 = vpop.f32.mrf.mxu0  ;;  %v683_v29 = vpop.f32.mrf.mxu1  ;;  %v354_v6 = vmul.f32 %v857_v25, %v850_v23  ;;  %v362_v8 = vmul.f32 %v857_v25, %v852_v24 }
 0x102   :  { %v424_v30 = vsel %vm420_vm0, 1.0, %v675_v28  ;;  %v432_v31 = vsel %vm420_vm0, 1.0, %v683_v29  ;;  %v285_v33 = vmul.f32 %v675_v28, %v846_v18  ;;  %v293_v47 = vmul.f32 %v683_v29, %v846_v18 }
 0x103   :  { %v601_v34 = vpack.c.bf16 %v424_v30, %v423_v26  ;;  %v621_v35 = vpack.c.bf16 %v432_v31, %v431_v27  ;;  %v215_v36 = vpop.f32.mrf.mxu0  ;;  %v247_v37 = vpop.f32.mrf.mxu1  ;;  %v357_v53 = vmul.f32 %v675_v28, %v857_v25  ;;  %v365_v5 = vmul.f32 %v683_v29, %v857_v25 }
 0x104   :  { %v422_v40 = vsel %vm420_vm0, 1.0, %v215_v36  ;;  %v430_v41 = vsel %vm420_vm0, 1.0, %v247_v37  ;;  %374 = vadd.xlane.f32.xlu0 %v356_v32  ;;  %304 = vadd.xlane.f32.xlu1 %v285_v33  ;;  %v291_v7 = vmul.f32 %v846_v18, %v247_v37  ;;  %v355_v9 = vmul.f32 %v857_v25, %v215_v36 }
 0x105   :  { %633 = vst [vmem:[#allocation7 + $0x8] sm:$0xff] %v601_v34   ;;  %637 = vst [vmem:[#allocation7 + $0x28] sm:$0xff] %v621_v35   ;;  %v596_v42 = vpack.c.bf16 %v422_v40, %v421_v38  ;;  %v616_v43 = vpack.c.bf16 %v430_v41, %v429_v39  ;;  %v678_v44 = vpop.f32.mrf.mxu0  ;;  %v871_v45 = vpop.f32.mrf.mxu1  ;;  %v363_v10 = vmul.f32 %v857_v25, %v247_v37 }
 0x106   :  { %v427_v50 = vsel %vm420_vm0, 1.0, %v678_v44  ;;  %v435_v51 = vsel %vm420_vm0, 1.0, %v871_v45  ;;  %v283_v11 = vmul.f32 %v846_v18, %v215_v36  ;;  %v288_v12 = vmul.f32 %v678_v44, %v846_v18 }
 0x107   :  { %597 = vst [vmem:[#allocation7] sm:$0xff] %v596_v42   ;;  %636 = vst [vmem:[#allocation7 + $0x20] sm:$0xff] %v616_v43   ;;  %v875_v48 = vpop.f32.mrf.mxu0  ;;  %v877_v49 = vpop.f32.mrf.mxu1  ;;  %v296_v14 = vmul.f32 %v871_v45, %v846_v18  ;;  %v360_v16 = vmul.f32 %v678_v44, %v857_v25  ;;  %v368_v28 = vmul.f32 %v871_v45, %v857_v25 }
 0x108   :  { %390 = vadd.xlane.f32.xlu0 %v364_v46  ;;  %320 = vadd.xlane.f32.xlu1 %v293_v47  ;;  %v425_v56 = vsel %vm420_vm0, 1.0, %v875_v48  ;;  %v433_v58 = vsel %vm420_vm0, 1.0, %v877_v49  ;;  %v286_v19 = vmul.f32 %v846_v18, %v875_v48  ;;  %v294_v21 = vmul.f32 %v846_v18, %v877_v49 }
 0x109   :  { %v679_v54 = vpop.f32.mrf.mxu0  ;;  %v885_v55 = vpop.f32.mrf.mxu1  ;;  %v358_v23 = vmul.f32 %v857_v25, %v875_v48  ;;  %v366_v26 = vmul.f32 %v857_v25, %v877_v49 }
 0x10a   :  { %v428_v57 = vsel %vm420_vm0, 1.0, %v679_v54  ;;  %v436_v59 = vsel %vm420_vm0, 1.0, %v885_v55  ;;  %v289_v13 = vmul.f32 %v679_v54, %v846_v18  ;;  %v297_v15 = vmul.f32 %v885_v55, %v846_v18 }
 0x10b   :  { %v611_v60 = vpack.c.bf16 %v428_v57, %v427_v50  ;;  %v231_v61 = vpop.f32.mrf.mxu0  ;;  %v631_v62 = vpack.c.bf16 %v436_v59, %v435_v51  ;;  %v263_v63 = vpop.f32.mrf.mxu1  ;;  %v361_v17 = vmul.f32 %v679_v54, %v857_v25 }
 0x10c   :  { %298 = vadd.xlane.f32.xlu0 %v282_v52  ;;  %376 = vadd.xlane.f32.xlu1 %v357_v53  ;;  %v426_v0 = vsel %vm420_vm0, 1.0, %v231_v61  ;;  %v434_v1 = vsel %vm420_vm0, 1.0, %v263_v63  ;;  %v287_v20 = vmul.f32 %v846_v18, %v231_v61  ;;  %v295_v22 = vmul.f32 %v846_v18, %v263_v63 }
 0x10d   :  { %635 = vst [vmem:[#allocation7 + $0x18] sm:$0xff] %v611_v60   ;;  %v606_v2 = vpack.c.bf16 %v426_v0, %v425_v56  ;;  %639 = vst [vmem:[#allocation7 + $0x38] sm:$0xff] %v631_v62   ;;  %v626_v3 = vpack.c.bf16 %v434_v1, %v433_v58  ;;  %v359_v24 = vmul.f32 %v857_v25, %v231_v61 }
 0x10e   :  { %v367_v27 = vmul.f32 %v857_v25, %v263_v63  ;;  %v369_v18 = vmul.f32 %v885_v55, %v857_v25 }
 0x10f   :  { %634 = vst [vmem:[#allocation7 + $0x10] sm:$0xff] %v606_v2   ;;  %638 = vst [vmem:[#allocation7 + $0x30] sm:$0xff] %v626_v3  }
 0x110   :  { %314 = vadd.xlane.f32.xlu0 %v290_v4  ;;  %392 = vadd.xlane.f32.xlu1 %v365_v5 }
 0x114   :  { %370 = vadd.xlane.f32.xlu0 %v354_v6  ;;  %316 = vadd.xlane.f32.xlu1 %v291_v7 }
 0x118   :  { %386 = vadd.xlane.f32.xlu0 %v362_v8  ;;  %372 = vadd.xlane.f32.xlu1 %v355_v9 }
 0x11c   :  { %388 = vadd.xlane.f32.xlu1 %v363_v10  ;;  %300 = vadd.xlane.f32.xlu0 %v283_v11 }
 0x120   :  { %310 = vadd.xlane.f32.xlu0 %v288_v12  ;;  %312 = vadd.xlane.f32.xlu1 %v289_v13 }
 0x124   :  { %326 = vadd.xlane.f32.xlu0 %v296_v14  ;;  %328 = vadd.xlane.f32.xlu1 %v297_v15 }
 0x128   :  { %382 = vadd.xlane.f32.xlu0 %v360_v16  ;;  %384 = vadd.xlane.f32.xlu1 %v361_v17 }
 0x12c   :  { %306 = vadd.xlane.f32.xlu0 %v286_v19  ;;  %308 = vadd.xlane.f32.xlu1 %v287_v20 }
 0x130   :  { %322 = vadd.xlane.f32.xlu0 %v294_v21  ;;  %324 = vadd.xlane.f32.xlu1 %v295_v22 }
 0x134   :  { %378 = vadd.xlane.f32.xlu0 %v358_v23  ;;  %380 = vadd.xlane.f32.xlu1 %v359_v24 }
 0x138   :  { %394 = vadd.xlane.f32.xlu0 %v366_v26  ;;  %396 = vadd.xlane.f32.xlu1 %v367_v27 }
 0x13c   :  { %398 = vadd.xlane.f32.xlu0 %v368_v28  ;;  %400 = vadd.xlane.f32.xlu1 %v369_v18 }
 0x13d   :  { %776 = shalt.err (!%p773_p0)
}
 0x13e   :  { %528 = dma.vmem_to_hbm [thread:$0]  %s523_s3, 1024, %s1069_s4, [#allocation4], %s792_s24, %s792_s24, %s793_s25   ;;  %vm330_vm1 = vcmask 7168  }
 0x189   :  { %v319_v25 = vpop.xlane.xlu0 %318  ;;  %v303_v29 = vpop.xlane.xlu1 %302 }
 0x18a   :  { %341 = vst.msk [vmem:[%s1070_s5 + $0x50] sm:$0xff] %vm330_vm1, %v319_v25  ;;  %333 = vst.msk [vmem:[%s1070_s5 + $0x10] sm:$0xff] %vm330_vm1, %v303_v29 }
 0x18d   :  { %v375_v30 = vpop.xlane.xlu0 %374  ;;  %v305_v31 = vpop.xlane.xlu1 %304 }
 0x18e   :  { %404 = vst.msk [vmem:[%s1071_s6 + $0x10] sm:$0xff] %vm330_vm1, %v375_v30  ;;  %334 = vst.msk [vmem:[%s1070_s5 + $0x18] sm:$0xff] %vm330_vm1, %v305_v31 }
 0x191   :  { %v391_v32 = vpop.xlane.xlu0 %390  ;;  %v321_v33 = vpop.xlane.xlu1 %320 }
 0x192   :  { %412 = vst.msk [vmem:[%s1071_s6 + $0x50] sm:$0xff] %vm330_vm1, %v391_v32  ;;  %342 = vst.msk [vmem:[%s1070_s5 + $0x58] sm:$0xff] %vm330_vm1, %v321_v33 }
 0x195   :  { %v299_v34 = vpop.xlane.xlu0 %298  ;;  %v377_v35 = vpop.xlane.xlu1 %376 }
 0x196   :  { %331 = vst.msk [vmem:[%s1070_s5] sm:$0xff] %vm330_vm1, %v299_v34  ;;  %405 = vst.msk [vmem:[%s1071_s6 + $0x18] sm:$0xff] %vm330_vm1, %v377_v35 }
 0x199   :  { %v315_v36 = vpop.xlane.xlu0 %314  ;;  %v393_v37 = vpop.xlane.xlu1 %392 }
 0x19a   :  { %339 = vst.msk [vmem:[%s1070_s5 + $0x40] sm:$0xff] %vm330_vm1, %v315_v36  ;;  %413 = vst.msk [vmem:[%s1071_s6 + $0x58] sm:$0xff] %vm330_vm1, %v393_v37 }
 0x19d   :  { %v371_v38 = vpop.xlane.xlu0 %370  ;;  %v317_v39 = vpop.xlane.xlu1 %316 }
 0x19e   :  { %402 = vst.msk [vmem:[%s1071_s6] sm:$0xff] %vm330_vm1, %v371_v38  ;;  %340 = vst.msk [vmem:[%s1070_s5 + $0x48] sm:$0xff] %vm330_vm1, %v317_v39 }
 0x1a1   :  { %v387_v40 = vpop.xlane.xlu0 %386  ;;  %v373_v41 = vpop.xlane.xlu1 %372 }
 0x1a2   :  { %410 = vst.msk [vmem:[%s1071_s6 + $0x40] sm:$0xff] %vm330_vm1, %v387_v40  ;;  %403 = vst.msk [vmem:[%s1071_s6 + $0x8] sm:$0xff] %vm330_vm1, %v373_v41 }
 0x1a5   :  { %v389_v42 = vpop.xlane.xlu1 %388  ;;  %v301_v43 = vpop.xlane.xlu0 %300 }
 0x1a6   :  { %411 = vst.msk [vmem:[%s1071_s6 + $0x48] sm:$0xff] %vm330_vm1, %v389_v42  ;;  %332 = vst.msk [vmem:[%s1070_s5 + $0x8] sm:$0xff] %vm330_vm1, %v301_v43 }
 0x1a9   :  { %v311_v44 = vpop.xlane.xlu0 %310  ;;  %v313_v45 = vpop.xlane.xlu1 %312 }
 0x1aa   :  { %337 = vst.msk [vmem:[%s1070_s5 + $0x30] sm:$0xff] %vm330_vm1, %v311_v44  ;;  %338 = vst.msk [vmem:[%s1070_s5 + $0x38] sm:$0xff] %vm330_vm1, %v313_v45 }
 0x1ad   :  { %v327_v46 = vpop.xlane.xlu0 %326  ;;  %v329_v47 = vpop.xlane.xlu1 %328 }
 0x1ae   :  { %345 = vst.msk [vmem:[%s1070_s5 + $0x70] sm:$0xff] %vm330_vm1, %v327_v46  ;;  %346 = vst.msk [vmem:[%s1070_s5 + $0x78] sm:$0xff] %vm330_vm1, %v329_v47 }
 0x1b1   :  { %v383_v48 = vpop.xlane.xlu0 %382  ;;  %v385_v49 = vpop.xlane.xlu1 %384 }
 0x1b2   :  { %408 = vst.msk [vmem:[%s1071_s6 + $0x30] sm:$0xff] %vm330_vm1, %v383_v48  ;;  %409 = vst.msk [vmem:[%s1071_s6 + $0x38] sm:$0xff] %vm330_vm1, %v385_v49 }
 0x1b5   :  { %v307_v50 = vpop.xlane.xlu0 %306  ;;  %v309_v51 = vpop.xlane.xlu1 %308 }
 0x1b6   :  { %335 = vst.msk [vmem:[%s1070_s5 + $0x20] sm:$0xff] %vm330_vm1, %v307_v50  ;;  %336 = vst.msk [vmem:[%s1070_s5 + $0x28] sm:$0xff] %vm330_vm1, %v309_v51 }
 0x1b9   :  { %v323_v52 = vpop.xlane.xlu0 %322  ;;  %v325_v53 = vpop.xlane.xlu1 %324 }
 0x1ba   :  { %343 = vst.msk [vmem:[%s1070_s5 + $0x60] sm:$0xff] %vm330_vm1, %v323_v52  ;;  %344 = vst.msk [vmem:[%s1070_s5 + $0x68] sm:$0xff] %vm330_vm1, %v325_v53 }
 0x1bd   :  { %v379_v54 = vpop.xlane.xlu0 %378  ;;  %v381_v55 = vpop.xlane.xlu1 %380 }
 0x1be   :  { %406 = vst.msk [vmem:[%s1071_s6 + $0x20] sm:$0xff] %vm330_vm1, %v379_v54  ;;  %407 = vst.msk [vmem:[%s1071_s6 + $0x28] sm:$0xff] %vm330_vm1, %v381_v55 }
 0x1c1   :  { %v395_v56 = vpop.xlane.xlu0 %394  ;;  %v397_v57 = vpop.xlane.xlu1 %396 }
 0x1c2   :  { %414 = vst.msk [vmem:[%s1071_s6 + $0x60] sm:$0xff] %vm330_vm1, %v395_v56  ;;  %415 = vst.msk [vmem:[%s1071_s6 + $0x68] sm:$0xff] %vm330_vm1, %v397_v57 }
 0x1c5   :  { %v399_v58 = vpop.xlane.xlu0 %398  ;;  %v401_v59 = vpop.xlane.xlu1 %400 }
 0x1c6   :  { %416 = vst.msk [vmem:[%s1071_s6 + $0x70] sm:$0xff] %vm330_vm1, %v399_v58  ;;  %417 = vst.msk [vmem:[%s1071_s6 + $0x78] sm:$0xff] %vm330_vm1, %v401_v59 }
 0x1c7   :  { %789 = dma.done.wait [#allocation4], 1024  }
 0x1c8   :  { %790 = vsyncadd [#allocation4], 4294966272 }
 0x1c9   :  { %540 = vsyncpa [#allocation3], 1 }
 0x1ca   :  { %541 = vsyncpa [#allocation6], 1 }
 0x1cb   :  { %542 = vsyncpa [#allocation4], 1 }

</bundles_post_ra>
